<compile_context>
chip_gen: v7x
topology: tpu7x:2x2x1
jax: 0.10.0
libtpu: 0.0.40
codegen_flags: <defaults>
</compile_context>

<pallas_src>
import jax
import jax.numpy as jnp
from jax import lax
from jax.experimental import pallas as pl
from jax.experimental.pallas import tpu as pltpu

_EPS = 1e-8                 # torch.nn.CosineSimilarity default eps
_DEFAULT_TILE_N = 8192      # rows per grid step (sweep 4096-16384)


def _round_up(x, m):
    return ((x + m - 1) // m) * m


def _vmem_capacity_bytes():
    # Generation-aware VMEM capacity (v5e/v6e: 128 MiB, v7x: 64 MiB per TC).
    try:
        return int(pltpu.get_tpu_info().vmem_capacity_bytes)
    except Exception:
        return 64 * 2**20   # conservative fallback = smallest (v7x per-TC)


def _cos_sim_kernel(w_ref, lt_ref, o_ref):
    # w_ref : (TILE_N, D)  word-embedding tile (f32 or bf16)
    # lt_ref: (D, L)       labels, already unit-normalized + transposed
    # o_ref : (TILE_N, L)  f32 output tile (true width L, no lane padding)
    w = w_ref[...]

    # MXU: all-pairs dot products against the pre-normalized label matrix.
    dots = jnp.dot(w, lt_ref[...], preferred_element_type=jnp.float32)

    # Word-side inverse norm: EUP rsqrt, clamped so it equals
    # 1 / max(||w||, eps) (torch's per-operand eps clamp).
    wf = w.astype(jnp.float32)
    sq = jnp.sum(wf * wf, axis=-1, keepdims=True)              # (TILE_N, 1)
    inv_w = jnp.minimum(lax.rsqrt(sq), jnp.float32(1.0 / _EPS))

    # VPU multiply (broadcast over lanes); output stays f32.
    o_ref[...] = dots * inv_w


def cosine_similarity_pallas(word_embs_flat, label_emb_table, *,
                             tile_n=_DEFAULT_TILE_N, input_buffers=2):
    """All-pairs cosine similarity: (N, D) x (L, D) -> (N, L) in f32.

    `word_embs_flat` may be f32 (exact) or bf16 (halved input HBM traffic);
    the labels are normalized in f32 and cast to match.
    """
    N, D = word_embs_flat.shape
    L, D2 = label_emb_table.shape
    assert D == D2
    compute_dtype = word_embs_flat.dtype

    # ---- label-side work hoisted out of the hot loop (tiny: L x D) --------
    lab_f32 = label_emb_table.astype(jnp.float32)
    l_norm = jnp.maximum(
        jnp.sqrt(jnp.sum(lab_f32 * lab_f32, axis=-1, keepdims=True)), _EPS)
    lt = (lab_f32 / l_norm).T.astype(compute_dtype)            # (D, L), unit cols

    # ---- tile selection: big tiles to amortize per-step overhead, but keep
    #      >= 2 grid steps so v7x's two TensorCores both get work -----------
    tile_n = int(tile_n) if int(tile_n) > 0 else _DEFAULT_TILE_N
    max_tile_for_two_steps = _round_up(pl.cdiv(N, 2), 8)
    tile_n = max(8, min(_round_up(tile_n, 8), max_tile_for_two_steps))
    grid = (pl.cdiv(N, tile_n),)   # no jnp.pad: partial last block handled
                                   # by the pipeline (OOB stores dropped)

    # ---- tight, generation-aware VMEM budget -------------------------------
    in_bytes = jnp.dtype(compute_dtype).itemsize
    word_tile_bytes = tile_n * D * in_bytes
    out_tile_bytes = tile_n * L * 4
    label_bytes = D * L * in_bytes
    bufs = max(2, int(input_buffers))
    vmem_need = bufs * word_tile_bytes + 2 * out_tile_bytes + 2 * label_bytes
    vmem_cap = _vmem_capacity_bytes()
    vmem_limit = int(min(max(vmem_need + (4 << 20), 16 << 20), vmem_cap // 2))

    # Optional deeper input buffering (sweepable; default 2 = plain spec).
    word_spec_kwargs = {}
    if bufs != 2:
        word_spec_kwargs["pipeline_mode"] = pl.Buffered(bufs)
    word_spec = pl.BlockSpec((tile_n, D), lambda i: (i, 0), **word_spec_kwargs)

    out = pl.pallas_call(
        _cos_sim_kernel,
        out_shape=jax.ShapeDtypeStruct((N, L), jnp.float32),
        grid=grid,
        in_specs=[
            word_spec,                                   # streamed word rows
            pl.BlockSpec((D, L), lambda i: (0, 0)),      # resident labels
        ],
        out_specs=pl.BlockSpec((tile_n, L), lambda i: (i, 0)),
        compiler_params=pltpu.CompilerParams(
            dimension_semantics=("parallel",),
            vmem_limit_bytes=vmem_limit),
    )(word_embs_flat, lt)
    return out


def random_embedding(key, vocab_size, embedding_dim):
    # Mirrors WordRep.random_embedding: uniform(-scale, scale), scale=sqrt(3/dim)
    scale = jnp.sqrt(3.0 / embedding_dim)
    return jax.random.uniform(
        key, (vocab_size, embedding_dim), minval=-scale, maxval=scale,
        dtype=jnp.float32)


def word_rep_forward(word_inputs, word_emb_table, label_emb_table,
                     sentence_level=False, compute_dtype=jnp.float32,
                     tile_n=_DEFAULT_TILE_N):
    """word_inputs: (B, S) int32 token ids."""
    B, S = word_inputs.shape
    D = word_emb_table.shape[1]

    # Embedding lookup (plain JAX gather; word_embs is a module output so it
    # must land in HBM regardless -- see TODO(synk) in the header).
    word_embs = jnp.take(word_emb_table, word_inputs, axis=0)  # (B, S, D)
    orig_word_embs = word_embs

    if not sentence_level:
        w_flat = word_embs.reshape(B * S, D)
        if w_flat.dtype != compute_dtype:
            # cast fuses with the gather output in XLA (no extra HBM copy)
            w_flat = w_flat.astype(compute_dtype)
        ls_flat = cosine_similarity_pallas(
            w_flat, label_emb_table, tile_n=tile_n)             # (B*S, L)
        LS_embs = ls_flat.reshape(B, S, -1)                     # (B, S, L)
    else:
        LS_embs = None

    # word_list = [word_embs] (use_char=False) -> cat is identity;
    # dropout is identity in eval mode.
    word_represent = word_embs
    return word_represent, LS_embs, orig_word_embs


if __name__ == "__main__":
    # Small, deterministic shapes consistent with the module:
    B, S = 2, 8            # batch, sent_len
    D = 32                 # word_emb_dim == label_embedding_dim
    V = 50                 # word_alphabet size
    L = 16                 # label_alphabet size

    key = jax.random.PRNGKey(0)
    k_word, k_label, k_ids, k_ids2 = jax.random.split(key, 4)

    word_emb_table = random_embedding(k_word, V, D)
    label_emb_table = random_embedding(k_label, L, D)
    word_inputs = jax.random.randint(k_ids, (B, S), 0, V, dtype=jnp.int32)

    # f32 path (exact torch-like numerics).
    word_represent, LS_embs, orig_word_embs = word_rep_forward(
        word_inputs, word_emb_table, label_emb_table, sentence_level=False)
    jax.block_until_ready((word_represent, LS_embs, orig_word_embs))

    # Pure-JAX reference for the cosine-similarity path.
    def cos_ref(ids):
        we = jnp.take(word_emb_table, ids, axis=0)
        num = jnp.einsum("bsd,ld->bsl", we, label_emb_table)
        wn = jnp.maximum(jnp.linalg.norm(we, axis=-1, keepdims=True), _EPS)
        ln = jnp.maximum(jnp.linalg.norm(label_emb_table, axis=-1), _EPS)
        return num / (wn * ln[None, None, :])

    ref = cos_ref(word_inputs)
    assert LS_embs.shape == (B, S, L)
    assert word_represent.shape == (B, S, D)
    assert orig_word_embs.shape == (B, S, D)
    assert jnp.allclose(LS_embs, ref, atol=1e-5, rtol=1e-5)

    # Partial-last-block case (N = 15 rows -> grid of 2 with a ragged tail).
    B2, S2 = 3, 5
    word_inputs2 = jax.random.randint(k_ids2, (B2, S2), 0, V, dtype=jnp.int32)
    _, LS_embs2, _ = word_rep_forward(
        word_inputs2, word_emb_table, label_emb_table, sentence_level=False)
    jax.block_until_ready(LS_embs2)
    assert jnp.allclose(LS_embs2, cos_ref(word_inputs2), atol=1e-5, rtol=1e-5)

    # sentence_level=True skips the similarity branch entirely.
    _, LS_none, _ = word_rep_forward(
        word_inputs, word_emb_table, label_emb_table, sentence_level=True)
    assert LS_none is None

    # bf16 matmul-input path (halved word-stream HBM bytes); looser tolerance.
    _, LS_embs_bf16, _ = word_rep_forward(
        word_inputs, word_emb_table, label_emb_table,
        sentence_level=False, compute_dtype=jnp.bfloat16)
    jax.block_until_ready(LS_embs_bf16)
    assert jnp.allclose(LS_embs_bf16, ref, atol=5e-2, rtol=5e-2)

    print("KERNEL_OK")
</pallas_src>

<mosaic_0001>
module attributes {stable_mosaic.version = 11 : i64} {
  func.func @_cos_sim_kernel(%arg0: i32, %arg1: memref<8x32xf32, #tpu.memory_space<vmem>>, %arg2: memref<32x16xf32, #tpu.memory_space<vmem>>, %arg3: memref<8x16xf32, #tpu.memory_space<vmem>>) attributes {dimension_semantics = [#tpu.dimension_semantics<parallel>], iteration_bounds = array<i64: 2>, scalar_prefetch = 0 : i64, scratch_operands = 0 : i64, tpu.core_type = #tpu.core_type<tc>, window_params = [{transform_indices = @transform_0, window_bounds = array<i64: 8, 32>}, {pipeline_mode = #tpu.pipeline_mode<synchronous>, transform_indices = @transform_1, window_bounds = array<i64: 32, 16>}, {transform_indices = @transform_2, window_bounds = array<i64: 8, 16>}]} {
    %c0 = arith.constant 0 : index
    %c0_0 = arith.constant 0 : index
    %0 = vector.load %arg1[%c0, %c0_0] : memref<8x32xf32, #tpu.memory_space<vmem>>, vector<8x32xf32>
    %c0_1 = arith.constant 0 : index
    %c0_2 = arith.constant 0 : index
    %1 = vector.load %arg2[%c0_1, %c0_2] : memref<32x16xf32, #tpu.memory_space<vmem>>, vector<32x16xf32>
    %cst = arith.constant dense<0.000000e+00> : vector<8x16xf32>
    %2 = tpu.matmul %0, %1, %cst {dimension_numbers = #tpu.dot_dimension_numbers<[1], [0], [0], [1], [0, 0, 1, 1], [], []>} : vector<8x32xf32>, vector<32x16xf32>, vector<8x16xf32> -> vector<8x16xf32>
    %3 = arith.mulf %0, %0 : vector<8x32xf32>
    %cst_3 = arith.constant dense<0.000000e+00> : vector<8xf32>
    %4 = vector.multi_reduction <add>, %3, %cst_3 [1] : vector<8x32xf32> to vector<8xf32>
    %5 = vector.shape_cast %4 : vector<8xf32> to vector<8x1xf32>
    %6 = math.rsqrt %5 : vector<8x1xf32>
    %cst_4 = arith.constant 1.000000e+08 : f32
    %7 = vector.broadcast %cst_4 : f32 to vector<8x1xf32>
    %8 = arith.minimumf %6, %7 : vector<8x1xf32>
    %9 = vector.broadcast %8 : vector<8x1xf32> to vector<8x16xf32>
    %10 = arith.mulf %2, %9 : vector<8x16xf32>
    %c0_5 = arith.constant 0 : index
    %c0_6 = arith.constant 0 : index
    %11 = vector.load %arg3[%c0_5, %c0_6] : memref<8x16xf32, #tpu.memory_space<vmem>>, vector<8x16xf32>
    tpu.vector_store %arg3[%c0_5, %c0_6], %10 {strides = array<i32>} : memref<8x16xf32, #tpu.memory_space<vmem>>, vector<8x16xf32>,
    return
  }
  func.func @transform_0(%arg0: i32) -> (i32, i32) {
    %c0_i32 = arith.constant 0 : i32
    %c0_i32_0 = arith.constant 0 : i32
    return %arg0, %c0_i32 : i32, i32
  }
  func.func @transform_1(%arg0: i32) -> (i32, i32) {
    %c0_i32 = arith.constant 0 : i32
    %c0_i32_0 = arith.constant 0 : i32
    %c0_i32_1 = arith.constant 0 : i32
    return %c0_i32, %c0_i32_0 : i32, i32
  }
  func.func @transform_2(%arg0: i32) -> (i32, i32) {
    %c0_i32 = arith.constant 0 : i32
    %c0_i32_0 = arith.constant 0 : i32
    return %arg0, %c0_i32 : i32, i32
  }
}

</mosaic_0001>

<bundles_post_ra>
// kernel: tpu_custom_call.1
= control target key start
LH: loop header
LB: loop body
LE: loop exit
PB: predicated region body
PF: predicated region fallthrough
CT: control target
= control target key end

     0   :  { %7 = vsyncpa [#allocation3], 0  ;;  %s572_s0 = inlined_call_operand.vmem [shape: f32[16,32], index: 0, kind: input, shape index: {}]   ;;  %s573_s1 = inlined_call_operand.vmem [shape: f32[32,16], index: 1, kind: input, shape index: {}]   ;;  %s574_s2 = inlined_call_operand.hbm [shape: f32[16,16], index: 2, kind: output, shape index: {}]  }
   0x1   :  { %9 = vsyncpa [#allocation3 + $0x1], 0  ;;  %s460_s9 = smov 0   ;;  %s462_s10 = smov 0  }
   0x2   :  { %s464_s11 = smov 0   ;;  %s466_s12 = smov 0  }
   0x3 LB: > { %s481_s13 = sadd.s32 4294967295, %s439_s12   ;;  %s300_s14 = sadd.s32 4294967294, %s439_s12   ;;  %s439_s12 = sphi %s466_s12, %s580_s12   ;;  %s435_s11 = sphi %s464_s11, %s579_s11   ;;  %s431_s10 = sphi %s462_s10, %s578_s10   ;;  %s427_s9 = sphi %s460_s9, %s577_s9  }
   0x4   : > { %s485_s15 = sadd.s32 1, %s439_s12   ;;  %s69_s16 = sadd.s32 1, %s435_s11 }
   0x5   : > { %s66_s17 = ssub.s32 %s439_s12, %s485_s15  ;;  %p79_p0 = scmp.ne.s32.totalorder %s435_s11, %s431_s10 }
   0x6   : > { %p67_p1 = scmp.eq.s32.totalorder %s66_s17, 0  ;;  %p80_p2 = scmp.eq.s32.totalorder %s481_s13, 1 }
   0x7   : > { %p85_p3 = scmp.ne.s32.totalorder %s431_s10, %s427_s9  ;;  %p86_p4 = scmp.eq.s32.totalorder %s300_s14, 1 }
   0x8   : > { %s496_s18 = scalar_select %p67_p1, %s435_s11, %s69_s16  }
   0x9   : > { %p498_p5 = por %p80_p2, %p79_p0  ;;  %p502_p6 = por %p86_p4, %p85_p3 }
   0xa   : > { %p303_p7 = scmp.ge.s32.totalorder %s439_s12, 1  ;;  %p114_p8 = scmp.lt.s32.totalorder %s439_s12, 3 }
   0xc   : > { %p115_p9 = pnand %p303_p7, %p114_p8 }
   0xd   : > { %v140_v0 = vld [vmem:[%s573_s1] sm:$0xff] (!%p115_p9)  ;;  %v141_v1 = vld [vmem:[%s573_s1 + $0x8] sm:$0xff] (!%p115_p9)  ;;  %v142_v2 = vld [vmem:[%s573_s1 + $0x10] sm:$0xff] (!%p115_p9)  ;;  %v441_v3 = vmov (!%p115_p9), 0.0|0.0   ;;  %vm442_vm0 = vmmov (!%p115_p9), 0   ;;  %v443_v6 = vmov (!%p115_p9), 0.0  }
   0xe   : > { %118 = sbr.rel (%p115_p9) target bundleno = 254 (0xfe), region = 28  ;;  %327 = vmatprep.subr.bf16.mxu0 (!%p115_p9), %v441_v3  ;;  %v328_v4 = vpack.c.bf16 (!%p115_p9), %v141_v1, %v140_v0  ;;  %v143_v5 = vld [vmem:[%s573_s1 + $0x18] sm:$0xff] (!%p115_p9)  ;;  %324 = vmatprep.mubr.msk.f32.mxu0 (!%p115_p9), %vm442_vm0, %v443_v6  ;;  %p135_p10 = scmp.lt.s32.totalorder (!%p115_p9), %s481_s13, 1  ;;  %vm144_vm1 = vcmask (!%p115_p9), 261120   ;;  %vm225_vm2 = vcmask (!%p115_p9), 130048  }
   0xf   : > { %v331_v7 = vpack.c.bf16 (!%p115_p9), %v143_v5, %v142_v2  ;;  %s132_s6 = sand.u32 (!%p115_p9), 1, %s431_s10   ;;  %s308_s8 = sshll.u32 (!%p115_p9), %s481_s13, 7 }
  0x10   : > { %329 = vmatpush3.bf16.msra.mxu0 (!%p115_p9), %v328_v4  ;;  %s304_s7 = sshll.u32 (!%p115_p9), %s132_s6, 3  ;;  %s530_s22 = scalar_lea.hbm (!%p115_p9), %s574_s2, %s308_s8 }
  0x11   : > { %330 = vmatprep.subr.bf16.mxu0 (!%p115_p9), %v441_v3  ;;  %s134_s14 = scalar_lea.vmem (!%p115_p9), [#allocation2], %s304_s7  ;;  %s228_s23 = scalar_lea.sflag (!%p115_p9), [#allocation3], %s132_s6 }
  0x12   : > { %s241_s16 = sshll.u32 (!%p115_p9), %s134_s14, 4  ;;  %s532_s16 = int_to_ptr.vmem [resolvable:$true] %s241_s16 }
  0x13   : > { %s377_s24 = scalar_lea.vmem (!%p115_p9), %s532_s16, 128 }
  0x14   : > { %332 = vmatpush3.bf16.msra.mxu0 (!%p115_p9), %v331_v7  ;;  %p378_p11 = scmp.ne.s32.totalorder (!%p115_p9), %s532_s16, %s377_s24 }
  0x15   : > { %s136_s29 = scalar_select %p135_p10, %s481_s13, 1 }
  0x16   : > { %p379_p12 = pnand %p378_p11, %p498_p5  ;;  %s444_s13 = smov [#allocation2]  }
  0x17   : > { %s305_s30 = sshll.u32 %s136_s29, 3  ;;  %s381_s25 = sshll.u32 %s444_s13, 4  ;;  %s382_s25 = int_to_ptr.vmem [resolvable:$false] %s381_s25 }
  0x18   : > { %s138_s5 = scalar_lea.vmem %s572_s0, %s305_s30  ;;  %p380_p13 = pneg %p379_p12 }
  0x19   : > { %v139_v8 = vld [vmem:[%s138_s5] sm:$0xff]  ;;  %s383_s26 = scalar_lea.vmem %s382_s25, 256  ;;  %p384_p0 = scmp.lt.s32.totalorder %s532_s16, %s382_s25 }
  0x1a   : > { %v218_v9 = vmul.f32 %v139_v8, %v139_v8  ;;  %325 = vmatmul.mubr.msk.f32.vlgmr.msra.gmra.mrb[0].mxu0 %vm144_vm1, %v139_v8  ;;  %p385_p1 = scmp.lt.s32.totalorder %s383_s26, %s377_s24 }
  0x1c   : > { %v219_v10 = vsel %vm144_vm1, %v218_v9, 0.0  ;;  %p386_p2 = por %p385_p1, %p384_p0 }
  0x1d   : > { %220 = vadd.xlane.f32.xlu0 %v219_v10 }
  0x1e   : > { %p387_p3 = pnand %p386_p2, %p380_p13 }
  0xaa   : > { %v221_v11 = vpop.xlane.xlu0 %220 }
  0xab   : > { %375 = vrsqrt.f32 %v221_v11 }
  0xb5   : > { %v376_v12 = vpop.eup %375 }
  0xb6   : > { %v223_v13 = vmin.f32 %v376_v12, 1e+08 }
  0xed   : > { %v214_v14 = vpop.f32.mrb[0].mxu0 }
  0xee   : > { %v224_v15 = vmul.f32 %v223_v13, %v214_v14  ;;  %v326_v16 = vpop.f32.mrb[1].mxu0 }
  0xf0   : > { %226 = vst.msk [vmem:[%s134_s14] sm:$0xff] %vm225_vm2, %v224_v15 }
  0xf1   : > { %390 = shalt.err (!%p387_p3)
}
  0xf2   : > { %s391_s27 = scalar_lea.hbm %s530_s22, 128  ;;  %s395_s30 = scalar_lea.hbm %s574_s2, 256 }
  0xf3   : > { %p392_p4 = scmp.ne.s32.totalorder %s530_s22, %s391_s27  ;;  %p396_p9 = scmp.lt.u32.totalorder %s530_s22, %s574_s2 }
  0xf4   : > { %p397_p10 = scmp.lt.u32.totalorder %s395_s30, %s391_s27  ;;  %p399_p12 = scmp.lt.u32.totalorder %s391_s27, %s530_s22 }
  0xf5   : > { %p393_p7 = pnand %p392_p4, %p498_p5 }
  0xf6   : > { %p398_p11 = por %p397_p10, %p396_p9 }
  0xf7   : > { %p394_p8 = pneg %p393_p7 }
  0xf8   : > { %p400_p13 = por %p399_p12, %p398_p11 }
  0xfa   : > { %p401_p0 = pnand %p400_p13, %p394_p8 }
  0xfc   : > { %404 = shalt.err (!%p401_p0)
}
  0xfd   : > { %333 = dma.vmem_to_hbm [thread:$0]  (%p498_p5), %s532_s16, 128, %s530_s22, %s228_s23  }
  0xfe PF: > { %p339_p1 = scmp.ge.s32.totalorder %s439_s12, 2  ;;  %s253_s5 = sand.u32 1, %s427_s9  }
  0xff   : > { %s254_s6 = scalar_lea.sflag [#allocation3], %s253_s5 }
 0x100   : > { %p336_p2 = pnand %p339_p1, %p502_p6 }
 0x102   : > { %422 = dma.done.wait (!%p336_p2), %s254_s6, 128  }
 0x103   : > { %424 = vsyncadd (!%p336_p2), %s254_s6, 4294967168  ;;  %p12_p3 = scmp.ge.s32.totalorder %s485_s15, 4   ;;  %s577_s9 = smov %s431_s10 }
 0x104   : > { %s578_s10 = smov %s435_s11  ;;  %s579_s11 = smov %s496_s18 }
 0x105   : > { %s580_s12 = smov %s485_s15  ;;  %14 = sbr.rel (!%p12_p3) target bundleno = 3 (0x3), region = 63 }
 0x10c   :  { %259 = vsyncpa [#allocation3], 1 }
 0x10d   :  { %261 = vsyncpa [#allocation3 + $0x1], 1 }

</bundles_post_ra>
